<compile_context>
chip_gen: v7x
topology: tpu7x:2x2x1
jax: 0.10.0
libtpu: 0.0.40
codegen_flags: <defaults>
</compile_context>

<pallas_src>
import math
from fractions import Fraction
from functools import partial
from math import factorial, sqrt, pi

import numpy as np
import jax
import jax.numpy as jnp
from jax import lax
from jax.experimental import pallas as pl
from jax.experimental.pallas import tpu as pltpu


# =====================  host-side setup (mirrors the module __init__)  =====================
# minimal stand-ins for e3nn Irreps: a list of (mul, l, parity)

IRREPS_IN1 = [(8, 0, 1), (8, 1, -1)]         # "8x0e + 8x1o"
IRREPS_OUT_REQ = [(8, 0, 1), (8, 1, -1)]     # requested output irreps of the gated layer
LMAX_HS = 10
IRREP_HS = [(1, l, (-1) ** l) for l in range(LMAX_HS + 1)]   # Irreps.spherical_harmonics(10)


def _irreps_dim(irreps):
    return sum(mul * (2 * l + 1) for mul, l, _ in irreps)


def _irreps_slices(irreps):
    out, start = [], 0
    for mul, l, _ in irreps:
        stop = start + mul * (2 * l + 1)
        out.append((start, stop))
        start = stop
    return out


def _in_product(l1, p1, l2, p2, l_out, p_out):
    return (abs(l1 - l2) <= l_out <= l1 + l2) and (p1 * p2 == p_out)


def _path_exists(irreps_a, irreps_b, l_out, p_out):
    for _, la, pa in irreps_a:
        for _, lb, pb in irreps_b:
            if _in_product(la, pa, lb, pb, l_out, p_out):
                return True
    return False


def _simplify(irreps):
    out = []
    for mul, l, p in irreps:
        if out and out[-1][1] == l and out[-1][2] == p:
            out[-1] = (out[-1][0] + mul, l, p)
        else:
            out.append((mul, l, p))
    return out


# ---- Gate structure (O3onO2TensorProductSwishGateWeighted.__init__) ----
_SCALARS = [(m, l, p) for m, l, p in IRREPS_OUT_REQ if l == 0 and _path_exists(IRREPS_IN1, IRREP_HS, l, p)]
_GATED = [(m, l, p) for m, l, p in IRREPS_OUT_REQ if l > 0 and _path_exists(IRREPS_IN1, IRREP_HS, l, p)]
_GATE_P = 1 if _path_exists(IRREPS_IN1, IRREP_HS, 0, 1) else -1
_GATES = [(m, 0, _GATE_P) for m, _, _ in _GATED]
CONV_IRREPS_OUT = _simplify(_SCALARS + _GATES + _GATED)      # [(16, 0, +1), (8, 1, -1)]

# the kernel below is specialised to "one 0e block + one 1o block" on both sides
assert len(IRREPS_IN1) == 2 and IRREPS_IN1[0][1] == 0 and IRREPS_IN1[1][1] == 1
assert len(CONV_IRREPS_OUT) == 2 and CONV_IRREPS_OUT[0][1] == 0 and CONV_IRREPS_OUT[1][1] == 1

N_SCAL_IN = IRREPS_IN1[0][0]                 # 8
MUL_V_IN = IRREPS_IN1[1][0]                  # 8
N_SCAL = sum(m for m, _, _ in _SCALARS)      # 8   (activated scalars)
N_GATES = sum(m for m, _, _ in _GATES)       # 8   (gate scalars)
N_SCAL_TP = CONV_IRREPS_OUT[0][0]            # 16  (merged 0e block of the TP output)
MUL_V_OUT = CONV_IRREPS_OUT[1][0]            # 8
DIM_IN = _irreps_dim(IRREPS_IN1)             # 32
DIM_TP = _irreps_dim(CONV_IRREPS_OUT)        # 40
DIM_OUT = N_SCAL + 3 * MUL_V_OUT             # 32


# ---------------- real-basis Wigner 3j (e3nn convention), self-contained ----------------
def _su2_cg_coeff(j1, m1, j2, m2, j3, m3):
    if m3 != m1 + m2:
        return 0.0
    vmin = int(max(-j1 + j2 + m3, -j1 + m1, 0))
    vmax = int(min(j2 + j3 + m1, j3 - j1 + j2, j3 + m3))

    def f(n):
        return factorial(round(n))

    c = ((2.0 * j3 + 1.0) * Fraction(
        f(j3 + j1 - j2) * f(j3 - j1 + j2) * f(j1 + j2 - j3) * f(j3 + m3) * f(j3 - m3),
        f(j1 + j2 + j3 + 1) * f(j1 - m1) * f(j1 + m1) * f(j2 - m2) * f(j2 + m2))) ** 0.5
    s = 0
    for v in range(vmin, vmax + 1):
        s += (-1) ** int(v + j2 + m2) * Fraction(
            f(j2 + j3 + m1 - v) * f(j1 - m1 + v),
            f(v) * f(j3 - j1 + j2 - v) * f(j3 + m3 - v) * f(v + j1 - j2 - m3))
    return float(c * s)


def _su2_clebsch_gordan(j1, j2, j3):
    mat = np.zeros((2 * j1 + 1, 2 * j2 + 1, 2 * j3 + 1), dtype=np.float64)
    if abs(j1 - j2) <= j3 <= j1 + j2:
        for m1 in range(-j1, j1 + 1):
            for m2 in range(-j2, j2 + 1):
                if abs(m1 + m2) <= j3:
                    mat[j1 + m1, j2 + m2, j3 + m1 + m2] = _su2_cg_coeff(j1, m1, j2, m2, j3, m1 + m2)
    return mat / (2 * j3 + 1) ** 0.5


def _change_basis_real_to_complex(l):
    q = np.zeros((2 * l + 1, 2 * l + 1), dtype=np.complex128)
    for m in range(-l, 0):
        q[l + m, l + abs(m)] = 1.0 / sqrt(2)
        q[l + m, l - abs(m)] = -1j / sqrt(2)
    q[l, l] = 1.0
    for m in range(1, l + 1):
        q[l + m, l + abs(m)] = (-1) ** m / sqrt(2)
        q[l + m, l - abs(m)] = 1j * (-1) ** m / sqrt(2)
    return (-1j) ** l * q


def _wigner_3j(l1, l2, l3):
    q1 = _change_basis_real_to_complex(l1)
    q2 = _change_basis_real_to_complex(l2)
    q3 = _change_basis_real_to_complex(l3)
    c = _su2_clebsch_gordan(l1, l2, l3).astype(np.complex128)
    c = np.einsum("ij,kl,mn,ikm->jln", q1, q2, np.conj(q3), c)
    return np.real(c)  # imaginary part vanishes by construction (e3nn phase convention)


# m=0 component of e3nn spherical_harmonics(l, (0,1,0), normalize=True, normalization='integral')
NORM_HS = [sqrt((2 * l + 1) / (4.0 * pi)) for l in range(LMAX_HS + 1)]

_SLICE_OUT = _irreps_slices(CONV_IRREPS_OUT)
_SLICE_IN = _irreps_slices(IRREPS_IN1)

# --- index ranges (first __init__ loop; breaks at the first matching SH irrep) ---
OUT_HMO, IN_HMO = [], []
OUT_POS, OUT_NEG, IN_POS, IN_NEG = [], [], [], []
for o_idx, (_, l_o, p_o) in enumerate(CONV_IRREPS_OUT):
    for i_idx, (_, l_i, p_i) in enumerate(IRREPS_IN1):
        for _, l_f, p_f in IRREP_HS:
            if _in_product(l_i, p_i, l_f, p_f, l_o, p_o):
                so, eo = _SLICE_OUT[o_idx]
                si, ei = _SLICE_IN[i_idx]
                OUT_HMO.append(list(range(so + l_o, eo, 2 * l_o + 1)))
                IN_HMO.append(list(range(si + l_i, ei, 2 * l_i + 1)))
                for mo in range(1, min(l_o, l_i) + 1):
                    OUT_POS.append(list(range(so + l_o + mo, eo, 2 * l_o + 1)))
                    OUT_NEG.append(list(range(so + l_o - mo, eo, 2 * l_o + 1)))
                    IN_POS.append(list(range(si + l_i + mo, ei, 2 * l_i + 1)))
                    IN_NEG.append(list(range(si + l_i - mo, ei, 2 * l_i + 1)))
                break

# --- valid paths (second __init__ loop, no break) ---
VALIDS = {}
for o_idx, (mul_o, l_o, p_o) in enumerate(CONV_IRREPS_OUT):
    for i_idx, (mul_i, l_i, p_i) in enumerate(IRREPS_IN1):
        for f_idx, (_, l_f, p_f) in enumerate(IRREP_HS):
            if _in_product(l_i, p_i, l_f, p_f, l_o, p_o):
                VALIDS.setdefault((o_idx, i_idx), []).append(f_idx)

VALIDWEIGHTS = sum(CONV_IRREPS_OUT[o][0] * IRREPS_IN1[i][0] for (o, i) in VALIDS)

# --- normalization (irrep_normalization='component', path_normalization='element') ---
_NORM_COEFF = []
for (o_idx, i_idx), f_lst in VALIDS.items():
    alpha = 2 * CONV_IRREPS_OUT[o_idx][1] + 1
    x = sum(IRREPS_IN1[i_b][0] * len(f_b) for (o_b, i_b), f_b in VALIDS.items() if o_b == o_idx)
    if x > 0:
        alpha = alpha / x
    _NORM_COEFF.append(sqrt(alpha))

# --- hzero / hpos / hneg coefficients ---
HZERO, HPOS, HNEG = [], [], []
for n, ((o_idx, i_idx), f_lst) in enumerate(VALIDS.items()):
    l_out = CONV_IRREPS_OUT[o_idx][1]
    l_in = IRREPS_IN1[i_idx][1]
    czero, cpos, cneg = 0.0, [], []
    for f in f_lst:
        l_f = IRREP_HS[f][1]
        wig = _wigner_3j(l_in, l_f, l_out)
        czero += NORM_HS[l_f] * wig[l_in, l_f, l_out]
    for m in range(1, min(l_out, l_in) + 1):
        tp, tn = 0.0, 0.0
        for f in f_lst:
            l_f = IRREP_HS[f][1]
            wig = _wigner_3j(l_in, l_f, l_out)
            tp += NORM_HS[l_f] * wig[l_in + m, l_f, l_out + m]
            tn += NORM_HS[l_f] * wig[l_in + m, l_f, l_out - m]
        cpos.append(tp)
        cneg.append(tn)
    coeff = _NORM_COEFF[n]
    HZERO.append(czero * coeff)
    HPOS.append([c * coeff for c in cpos])
    HNEG.append([c * coeff for c in cneg])

# --- bias indices: every l=0 block of the TP output (bias=True) ---
BIAS_IDX = []
for blk_idx, (mul, l, p) in enumerate(CONV_IRREPS_OUT):
    if l == 0:
        s0, e0 = _SLICE_OUT[blk_idx]
        BIAS_IDX.extend(range(s0, e0))
BIAS_DIM = len(BIAS_IDX)
assert BIAS_DIM == N_SCAL_TP


def _silu_normalize2mom_cst():
    # TODO(synk): e3nn's normalize2mom uses a fixed-seed Monte-Carlo estimate of E[silu(z)^2],
    # z~N(0,1); we use exact Gauss-Hermite quadrature instead (<0.5% difference).
    xs, ws = np.polynomial.hermite_e.hermegauss(128)
    f = xs / (1.0 + np.exp(-xs))
    second_moment = float(np.sum(ws * f * f) / sqrt(2.0 * pi))
    return 1.0 / sqrt(second_moment)


_SILU_CST = _silu_normalize2mom_cst()


# --- layout permutations (kernel layout <-> e3nn layout) ---
def _comp_major_perm(n_scal, mul_v):
    perm = list(range(n_scal))
    for c in range(3):
        for ch in range(mul_v):
            perm.append(n_scal + 3 * ch + c)
    return np.asarray(perm, dtype=np.int32)


PERM_IN = _comp_major_perm(N_SCAL_IN, MUL_V_IN)          # kernel feature k <- e3nn feature PERM_IN[k]
PERM_TP_OUT = _comp_major_perm(N_SCAL_TP, MUL_V_OUT)
PERM_GATE_OUT = _comp_major_perm(N_SCAL, MUL_V_OUT)
INV_PERM_GATE_OUT = np.argsort(PERM_GATE_OUT).astype(np.int32)


def _assemble_dense_tp_matrix(w):
    """Dense (DIM_TP, DIM_IN) matrix of the shared-weight tensor product (e3nn layout)."""
    M = np.zeros((DIM_TP, DIM_IN), dtype=np.float64)
    strider, another = 0, 0
    for idx, hz in enumerate(HZERO):
        oi, ii = OUT_HMO[idx], IN_HMO[idx]
        msz = len(oi) * len(ii)
        W = w[strider:strider + msz].reshape(len(oi), len(ii))
        if hz != 0:
            M[np.ix_(oi, ii)] += hz * W
        for m in range(len(HPOS[idx])):
            op, on = OUT_POS[another], OUT_NEG[another]
            ip, ineg = IN_POS[another], IN_NEG[another]
            hp, hn = HPOS[idx][m], HNEG[idx][m]
            if hp != 0 or hn != 0:
                M[np.ix_(op, ip)] += hp * W
                M[np.ix_(op, ineg)] += -hn * W
                M[np.ix_(on, ip)] += hn * W
                M[np.ix_(on, ineg)] += hp * W
            another += 1
        strider += msz
    return M


# =====================  Pallas TPU kernel (the hot path)  =====================
def _tp_gate_kernel(x_ref, d_ref, pin_ref, mt_ref, b_ref, o_ref, xrot_ref):
    """Feature-major compute: batch on lanes (lane-dense), features on sublanes.

    x_ref   : (tb, 32)  batch-major input block in e3nn layout (straight from HBM)
    d_ref   : (9, tb)   per-sample l=1 rotation, row 3*i+j == D1[b, i, j]
    pin_ref : (32, 32)  e3nn -> kernel-layout permutation matrix
    mt_ref  : (40, 32)  dense shared-weight TP matrix (kernel layout, rows=out, cols=in)
    b_ref   : (16, 1)   bias on every l=0 row of the TP output
    o_ref   : (32, tb)  output block (kernel layout, feature-major)
    xrot_ref: (32, tb)  VMEM scratch holding the rotated input (assembled by slice stores)
    """
    x_bm = x_ref[...]
    d = d_ref[...]

    # e3nn->kernel permutation fused with the batch transpose on the MXU: P @ x^T  (A @ B^T).
    xk = lax.dot_general(pin_ref[...], x_bm, (((1,), (1,)), ((), ())),
                         preferred_element_type=jnp.float32)            # (32, tb)

    def drow(r):                                                        # (1, tb) sublane bcast
        return d[r:r + 1, :]

    xs = xk[0:N_SCAL_IN, :]
    xv = [xk[N_SCAL_IN + MUL_V_IN * j: N_SCAL_IN + MUL_V_IN * (j + 1), :] for j in range(3)]

    # O(2) 'in' transform: y_i = sum_j D_ij x_j  (same D for every channel of the 1o block).
    xrot_ref[0:N_SCAL_IN, :] = xs
    for i in range(3):
        xrot_ref[N_SCAL_IN + MUL_V_IN * i: N_SCAL_IN + MUL_V_IN * (i + 1), :] = (
            drow(3 * i + 0) * xv[0] + drow(3 * i + 1) * xv[1] + drow(3 * i + 2) * xv[2])

    # weighted tensor product on the SO(2)-projected features -> one MXU matmul.
    z = jnp.dot(mt_ref[...], xrot_ref[...], preferred_element_type=jnp.float32)   # (40, tb)

    zs = z[0:N_SCAL_TP, :] + b_ref[...]                                 # bias on all l=0 rows
    zv = [z[N_SCAL_TP + MUL_V_OUT * j: N_SCAL_TP + MUL_V_OUT * (j + 1), :] for j in range(3)]
    # O(2) 'out' transform with D^T: y_i = sum_j D_ji z_j
    zr = [drow(0 + i) * zv[0] + drow(3 + i) * zv[1] + drow(6 + i) * zv[2] for i in range(3)]

    # gate nonlinearity (e3nn Gate): normalized SiLU on scalars & gates; exp + approx
    # reciprocal both run on the EUP slot instead of a VPU divide.
    scal = zs[0:N_SCAL, :]
    gates = zs[N_SCAL:N_SCAL_TP, :]
    act_s = _SILU_CST * scal * pl.reciprocal(1.0 + jnp.exp(-scal), approx=True)
    act_g = _SILU_CST * gates * pl.reciprocal(1.0 + jnp.exp(-gates), approx=True)

    o_ref[0:N_SCAL, :] = act_s
    for i in range(3):
        o_ref[N_SCAL + MUL_V_OUT * i: N_SCAL + MUL_V_OUT * (i + 1), :] = act_g * zr[i]


def prepare_params(s_weight, bias):
    """Host-side, ONCE per weight update (kept out of the per-call hot path)."""
    M = _assemble_dense_tp_matrix(np.asarray(s_weight, np.float64))
    mt = jnp.asarray(M[np.ix_(PERM_TP_OUT, PERM_IN)], jnp.float32)      # (DIM_TP, DIM_IN)
    pin = jnp.asarray(np.eye(DIM_IN, dtype=np.float32)[PERM_IN, :])     # (DIM_IN, DIM_IN)
    b = jnp.asarray(bias, jnp.float32).reshape(N_SCAL_TP, 1)
    return {"mt": mt, "pin": pin, "bias": b}


@partial(jax.jit, static_argnames=("tb",))
def o3_on_o2_tp_swish_gate_forward(data_in1, D, params, *, tb=512):
    """Forward pass of O3onO2TensorProductSwishGateWeighted (shared weights, bias=True,
    trasformationO2='both', nonlinearity_type='gate').  D is a list with D[l-1] of shape
    (B, 2l+1, 2l+1); only l=1 is needed for this irreps configuration."""
    B = data_in1.shape[0]
    assert tb % 128 == 0
    tb_eff = tb if B >= tb else max(128, ((B + 127) // 128) * 128)
    B_pad = ((B + tb_eff - 1) // tb_eff) * tb_eff
    n_blocks = B_pad // tb_eff

    d_fm = D[0].reshape(B, 9).T                                          # (9, B) tiny glue
    x_p = data_in1
    if B_pad != B:                                                       # general batch sizes
        x_p = jnp.pad(data_in1, ((0, B_pad - B), (0, 0)))
        d_fm = jnp.pad(d_fm, ((0, 0), (0, B_pad - B)))

    out_fm = pl.pallas_call(
        _tp_gate_kernel,
        out_shape=jax.ShapeDtypeStruct((DIM_OUT, B_pad), jnp.float32),
        grid=(n_blocks,),
        in_specs=[
            pl.BlockSpec((tb_eff, DIM_IN), lambda i: (i, 0)),            # x  (batch-major)
            pl.BlockSpec((9, tb_eff), lambda i: (0, i)),                 # D  (feature-major)
            pl.BlockSpec((DIM_IN, DIM_IN), lambda i: (0, 0)),            # permutation
            pl.BlockSpec((DIM_TP, DIM_IN), lambda i: (0, 0)),            # TP matrix
            pl.BlockSpec((N_SCAL_TP, 1), lambda i: (0, 0)),              # bias
        ],
        out_specs=pl.BlockSpec((DIM_OUT, tb_eff), lambda i: (0, i)),     # lane-dense output
        scratch_shapes=[pltpu.VMEM((DIM_IN, tb_eff), jnp.float32)],
        compiler_params=pltpu.CompilerParams(dimension_semantics=("parallel",)),
    )(x_p, d_fm, params["pin"], params["mt"], params["bias"])

    # kernel (component-major, feature-major) -> e3nn (interleaved, batch-major) layout
    return out_fm[INV_PERM_GATE_OUT, :B].T


# =====================  pure numpy reference (mirrors the PyTorch loops)  =====================
def _reference_forward(x, d1, w, bias):
    data_in = x.copy()
    strider = 0
    for mul, l, _ in IRREPS_IN1:
        dim = 2 * l + 1
        if l != 0:
            for _ in range(mul):
                blk = data_in[:, strider:strider + dim]
                data_in[:, strider:strider + dim] = np.einsum('bij,bj->bi', d1, blk)
                strider += dim
        else:
            strider += mul

    data_out = np.zeros((x.shape[0], DIM_TP), dtype=np.float64)
    s_, a_ = 0, 0
    for idx, hz in enumerate(HZERO):
        oi, ii = OUT_HMO[idx], IN_HMO[idx]
        msz = len(oi) * len(ii)
        W = w[s_:s_ + msz].reshape(len(oi), len(ii))
        if hz != 0:
            data_out[:, oi] += np.einsum('ij,bj->bi', hz * W, data_in[:, ii])
        for m in range(len(HPOS[idx])):
            op, on = OUT_POS[a_], OUT_NEG[a_]
            ip, ineg = IN_POS[a_], IN_NEG[a_]
            hp, hn = HPOS[idx][m], HNEG[idx][m]
            if hp != 0 or hn != 0:
                data_out[:, op] += (np.einsum('ij,bj->bi', hp * W, data_in[:, ip])
                                    - np.einsum('ij,bj->bi', hn * W, data_in[:, ineg]))
                data_out[:, on] += (np.einsum('ij,bj->bi', hn * W, data_in[:, ip])
                                    + np.einsum('ij,bj->bi', hp * W, data_in[:, ineg]))
            a_ += 1
        s_ += msz

    strider = 0
    for mul, l, _ in CONV_IRREPS_OUT:
        dim = 2 * l + 1
        if l != 0:
            for _ in range(mul):
                blk = data_out[:, strider:strider + dim]
                data_out[:, strider:strider + dim] = np.einsum('bij,bj->bi', d1.transpose(0, 2, 1), blk)
                strider += dim
        else:
            strider += mul

    data_out[:, BIAS_IDX] += bias

    sc = data_out[:, :N_SCAL]
    gt = data_out[:, N_SCAL:N_SCAL_TP]
    vec = data_out[:, N_SCAL_TP:]
    silu = lambda t: t / (1.0 + np.exp(-t))
    sc_a = _SILU_CST * silu(sc)
    gt_a = _SILU_CST * silu(gt)
    vec = vec.reshape(x.shape[0], MUL_V_OUT, 3) * gt_a[:, :, None]
    return np.concatenate([sc_a, vec.reshape(x.shape[0], 3 * MUL_V_OUT)], axis=1)


# =====================  main  =====================
if __name__ == "__main__":
    key = jax.random.PRNGKey(0)
    kx, kd, kw, kb = jax.random.split(key, 4)

    B, TB = 1000, 256     # non-multiple batch exercises the padding path; 4 parallel grid steps

    # inputs: features in e3nn layout, plus per-sample l=1 Wigner-D (rotation about the O(2) axis)
    x = jax.random.normal(kx, (B, DIM_IN), dtype=jnp.float32)
    theta = jax.random.uniform(kd, (B,), minval=0.0, maxval=2.0 * math.pi, dtype=jnp.float32)
    c, s = jnp.cos(theta), jnp.sin(theta)
    z0, o1 = jnp.zeros_like(theta), jnp.ones_like(theta)
    d1 = jnp.stack([jnp.stack([c, z0, s], axis=-1),
                    jnp.stack([z0, o1, z0], axis=-1),
                    jnp.stack([-s, z0, c], axis=-1)], axis=1)            # (B, 3, 3)
    D = [d1]                                                             # D[l-1] -> (B, 2l+1, 2l+1)

    # deterministic parameter init (shared-weight branch: uniform(-1,1), bias uniform(-1,1))
    s_weight = jax.random.uniform(kw, (VALIDWEIGHTS,), minval=-1.0, maxval=1.0, dtype=jnp.float32)
    bias = jax.random.uniform(kb, (BIAS_DIM,), minval=-1.0, maxval=1.0, dtype=jnp.float32)

    params = prepare_params(s_weight, bias)                              # host assembly, once
    out = o3_on_o2_tp_swish_gate_forward(x, D, params, tb=TB)
    out = jax.block_until_ready(out)

    ref = _reference_forward(np.asarray(x, np.float64), np.asarray(d1, np.float64),
                             np.asarray(s_weight, np.float64), np.asarray(bias, np.float64))
    assert out.shape == (B, DIM_OUT) and out.dtype == jnp.float32
    err = float(np.max(np.abs(np.asarray(out, np.float64) - ref)))
    if not np.isfinite(err) or err > 1e-2:
        raise SystemExit(f"mismatch vs reference: max abs err = {err}")
    print("KERNEL_OK")
</pallas_src>

<mosaic_0001>
module attributes {stable_mosaic.version = 11 : i64} {
  func.func @_tp_gate_kernel(%arg0: i32, %arg1: memref<256x32xf32, #tpu.memory_space<vmem>>, %arg2: memref<9x256xf32, #tpu.memory_space<vmem>>, %arg3: memref<32x32xf32, #tpu.memory_space<vmem>>, %arg4: memref<40x32xf32, #tpu.memory_space<vmem>>, %arg5: memref<16x1xf32, #tpu.memory_space<vmem>>, %arg6: memref<32x256xf32, #tpu.memory_space<vmem>>, %arg7: memref<32x256xf32, #tpu.memory_space<vmem>>) attributes {dimension_semantics = [#tpu.dimension_semantics<parallel>], iteration_bounds = array<i64: 4>, scalar_prefetch = 0 : i64, scratch_operands = 1 : i64, tpu.core_type = #tpu.core_type<tc>, window_params = [{transform_indices = @transform_0, window_bounds = array<i64: 256, 32>}, {transform_indices = @transform_1, window_bounds = array<i64: 9, 256>}, {pipeline_mode = #tpu.pipeline_mode<synchronous>, transform_indices = @transform_2, window_bounds = array<i64: 32, 32>}, {pipeline_mode = #tpu.pipeline_mode<synchronous>, transform_indices = @transform_3, window_bounds = array<i64: 40, 32>}, {pipeline_mode = #tpu.pipeline_mode<synchronous>, transform_indices = @transform_4, window_bounds = array<i64: 16, 1>}, {transform_indices = @transform_5, window_bounds = array<i64: 32, 256>}]} {
    %c0 = arith.constant 0 : index
    %c0_0 = arith.constant 0 : index
    %0 = vector.load %arg1[%c0, %c0_0] : memref<256x32xf32, #tpu.memory_space<vmem>>, vector<256x32xf32>
    %c0_1 = arith.constant 0 : index
    %c0_2 = arith.constant 0 : index
    %1 = vector.load %arg2[%c0_1, %c0_2] : memref<9x256xf32, #tpu.memory_space<vmem>>, vector<9x256xf32>
    %c0_3 = arith.constant 0 : index
    %c0_4 = arith.constant 0 : index
    %2 = vector.load %arg3[%c0_3, %c0_4] : memref<32x32xf32, #tpu.memory_space<vmem>>, vector<32x32xf32>
    %cst = arith.constant dense<0.000000e+00> : vector<32x256xf32>
    %3 = tpu.matmul %2, %0, %cst {dimension_numbers = #tpu.dot_dimension_numbers<[1], [1], [0], [0], [0, 0, 1, 0], [], []>} : vector<32x32xf32>, vector<256x32xf32>, vector<32x256xf32> -> vector<32x256xf32>
    %4 = vector.extract_strided_slice %3 {offsets = [0, 0], sizes = [8, 256], strides = [1, 1]} : vector<32x256xf32> to vector<8x256xf32>
    %5 = vector.extract_strided_slice %3 {offsets = [8, 0], sizes = [8, 256], strides = [1, 1]} : vector<32x256xf32> to vector<8x256xf32>
    %6 = vector.extract_strided_slice %3 {offsets = [16, 0], sizes = [8, 256], strides = [1, 1]} : vector<32x256xf32> to vector<8x256xf32>
    %7 = vector.extract_strided_slice %3 {offsets = [24, 0], sizes = [8, 256], strides = [1, 1]} : vector<32x256xf32> to vector<8x256xf32>
    %c0_5 = arith.constant 0 : index
    %c0_6 = arith.constant 0 : index
    %8 = vector.load %arg7[%c0_5, %c0_6] : memref<32x256xf32, #tpu.memory_space<vmem>>, vector<8x256xf32>
    tpu.vector_store %arg7[%c0_5, %c0_6], %4 {strides = array<i32>} : memref<32x256xf32, #tpu.memory_space<vmem>>, vector<8x256xf32>,
    %9 = vector.extract_strided_slice %1 {offsets = [0, 0], sizes = [1, 256], strides = [1, 1]} : vector<9x256xf32> to vector<1x256xf32>
    %10 = vector.broadcast %9 : vector<1x256xf32> to vector<8x256xf32>
    %11 = arith.mulf %10, %5 : vector<8x256xf32>
    %12 = vector.extract_strided_slice %1 {offsets = [1, 0], sizes = [1, 256], strides = [1, 1]} : vector<9x256xf32> to vector<1x256xf32>
    %13 = vector.broadcast %12 : vector<1x256xf32> to vector<8x256xf32>
    %14 = arith.mulf %13, %6 : vector<8x256xf32>
    %15 = arith.addf %11, %14 : vector<8x256xf32>
    %16 = vector.extract_strided_slice %1 {offsets = [2, 0], sizes = [1, 256], strides = [1, 1]} : vector<9x256xf32> to vector<1x256xf32>
    %17 = vector.broadcast %16 : vector<1x256xf32> to vector<8x256xf32>
    %18 = arith.mulf %17, %7 : vector<8x256xf32>
    %19 = arith.addf %15, %18 : vector<8x256xf32>
    %c8 = arith.constant 8 : index
    %c0_7 = arith.constant 0 : index
    %20 = vector.load %arg7[%c8, %c0_7] : memref<32x256xf32, #tpu.memory_space<vmem>>, vector<8x256xf32>
    tpu.vector_store %arg7[%c8, %c0_7], %19 {strides = array<i32>} : memref<32x256xf32, #tpu.memory_space<vmem>>, vector<8x256xf32>,
    %21 = vector.extract_strided_slice %1 {offsets = [3, 0], sizes = [1, 256], strides = [1, 1]} : vector<9x256xf32> to vector<1x256xf32>
    %22 = vector.broadcast %21 : vector<1x256xf32> to vector<8x256xf32>
    %23 = arith.mulf %22, %5 : vector<8x256xf32>
    %24 = vector.extract_strided_slice %1 {offsets = [4, 0], sizes = [1, 256], strides = [1, 1]} : vector<9x256xf32> to vector<1x256xf32>
    %25 = vector.broadcast %24 : vector<1x256xf32> to vector<8x256xf32>
    %26 = arith.mulf %25, %6 : vector<8x256xf32>
    %27 = arith.addf %23, %26 : vector<8x256xf32>
    %28 = vector.extract_strided_slice %1 {offsets = [5, 0], sizes = [1, 256], strides = [1, 1]} : vector<9x256xf32> to vector<1x256xf32>
    %29 = vector.broadcast %28 : vector<1x256xf32> to vector<8x256xf32>
    %30 = arith.mulf %29, %7 : vector<8x256xf32>
    %31 = arith.addf %27, %30 : vector<8x256xf32>
    %c16 = arith.constant 16 : index
    %c0_8 = arith.constant 0 : index
    %32 = vector.load %arg7[%c16, %c0_8] : memref<32x256xf32, #tpu.memory_space<vmem>>, vector<8x256xf32>
    tpu.vector_store %arg7[%c16, %c0_8], %31 {strides = array<i32>} : memref<32x256xf32, #tpu.memory_space<vmem>>, vector<8x256xf32>,
    %33 = vector.extract_strided_slice %1 {offsets = [6, 0], sizes = [1, 256], strides = [1, 1]} : vector<9x256xf32> to vector<1x256xf32>
    %34 = vector.broadcast %33 : vector<1x256xf32> to vector<8x256xf32>
    %35 = arith.mulf %34, %5 : vector<8x256xf32>
    %36 = vector.extract_strided_slice %1 {offsets = [7, 0], sizes = [1, 256], strides = [1, 1]} : vector<9x256xf32> to vector<1x256xf32>
    %37 = vector.broadcast %36 : vector<1x256xf32> to vector<8x256xf32>
    %38 = arith.mulf %37, %6 : vector<8x256xf32>
    %39 = arith.addf %35, %38 : vector<8x256xf32>
    %40 = vector.extract_strided_slice %1 {offsets = [8, 0], sizes = [1, 256], strides = [1, 1]} : vector<9x256xf32> to vector<1x256xf32>
    %41 = vector.broadcast %40 : vector<1x256xf32> to vector<8x256xf32>
    %42 = arith.mulf %41, %7 : vector<8x256xf32>
    %43 = arith.addf %39, %42 : vector<8x256xf32>
    %c24 = arith.constant 24 : index
    %c0_9 = arith.constant 0 : index
    %44 = vector.load %arg7[%c24, %c0_9] : memref<32x256xf32, #tpu.memory_space<vmem>>, vector<8x256xf32>
    tpu.vector_store %arg7[%c24, %c0_9], %43 {strides = array<i32>} : memref<32x256xf32, #tpu.memory_space<vmem>>, vector<8x256xf32>,
    %c0_10 = arith.constant 0 : index
    %c0_11 = arith.constant 0 : index
    %45 = vector.load %arg4[%c0_10, %c0_11] : memref<40x32xf32, #tpu.memory_space<vmem>>, vector<40x32xf32>
    %c0_12 = arith.constant 0 : index
    %c0_13 = arith.constant 0 : index
    %46 = vector.load %arg7[%c0_12, %c0_13] : memref<32x256xf32, #tpu.memory_space<vmem>>, vector<32x256xf32>
    %cst_14 = arith.constant dense<0.000000e+00> : vector<40x256xf32>
    %47 = tpu.matmul %45, %46, %cst_14 {dimension_numbers = #tpu.dot_dimension_numbers<[1], [0], [0], [1], [0, 0, 1, 1], [], []>} : vector<40x32xf32>, vector<32x256xf32>, vector<40x256xf32> -> vector<40x256xf32>
    %48 = vector.extract_strided_slice %47 {offsets = [0, 0], sizes = [16, 256], strides = [1, 1]} : vector<40x256xf32> to vector<16x256xf32>
    %c0_15 = arith.constant 0 : index
    %c0_16 = arith.constant 0 : index
    %49 = vector.load %arg5[%c0_15, %c0_16] : memref<16x1xf32, #tpu.memory_space<vmem>>, vector<16x1xf32>
    %50 = vector.broadcast %49 : vector<16x1xf32> to vector<16x256xf32>
    %51 = arith.addf %48, %50 : vector<16x256xf32>
    %52 = vector.extract_strided_slice %47 {offsets = [16, 0], sizes = [8, 256], strides = [1, 1]} : vector<40x256xf32> to vector<8x256xf32>
    %53 = vector.extract_strided_slice %47 {offsets = [24, 0], sizes = [8, 256], strides = [1, 1]} : vector<40x256xf32> to vector<8x256xf32>
    %54 = vector.extract_strided_slice %47 {offsets = [32, 0], sizes = [8, 256], strides = [1, 1]} : vector<40x256xf32> to vector<8x256xf32>
    %55 = vector.extract_strided_slice %1 {offsets = [0, 0], sizes = [1, 256], strides = [1, 1]} : vector<9x256xf32> to vector<1x256xf32>
    %56 = vector.broadcast %55 : vector<1x256xf32> to vector<8x256xf32>
    %57 = arith.mulf %56, %52 : vector<8x256xf32>
    %58 = vector.extract_strided_slice %1 {offsets = [3, 0], sizes = [1, 256], strides = [1, 1]} : vector<9x256xf32> to vector<1x256xf32>
    %59 = vector.broadcast %58 : vector<1x256xf32> to vector<8x256xf32>
    %60 = arith.mulf %59, %53 : vector<8x256xf32>
    %61 = arith.addf %57, %60 : vector<8x256xf32>
    %62 = vector.extract_strided_slice %1 {offsets = [6, 0], sizes = [1, 256], strides = [1, 1]} : vector<9x256xf32> to vector<1x256xf32>
    %63 = vector.broadcast %62 : vector<1x256xf32> to vector<8x256xf32>
    %64 = arith.mulf %63, %54 : vector<8x256xf32>
    %65 = arith.addf %61, %64 : vector<8x256xf32>
    %66 = vector.extract_strided_slice %1 {offsets = [1, 0], sizes = [1, 256], strides = [1, 1]} : vector<9x256xf32> to vector<1x256xf32>
    %67 = vector.broadcast %66 : vector<1x256xf32> to vector<8x256xf32>
    %68 = arith.mulf %67, %52 : vector<8x256xf32>
    %69 = vector.extract_strided_slice %1 {offsets = [4, 0], sizes = [1, 256], strides = [1, 1]} : vector<9x256xf32> to vector<1x256xf32>
    %70 = vector.broadcast %69 : vector<1x256xf32> to vector<8x256xf32>
    %71 = arith.mulf %70, %53 : vector<8x256xf32>
    %72 = arith.addf %68, %71 : vector<8x256xf32>
    %73 = vector.extract_strided_slice %1 {offsets = [7, 0], sizes = [1, 256], strides = [1, 1]} : vector<9x256xf32> to vector<1x256xf32>
    %74 = vector.broadcast %73 : vector<1x256xf32> to vector<8x256xf32>
    %75 = arith.mulf %74, %54 : vector<8x256xf32>
    %76 = arith.addf %72, %75 : vector<8x256xf32>
    %77 = vector.extract_strided_slice %1 {offsets = [2, 0], sizes = [1, 256], strides = [1, 1]} : vector<9x256xf32> to vector<1x256xf32>
    %78 = vector.broadcast %77 : vector<1x256xf32> to vector<8x256xf32>
    %79 = arith.mulf %78, %52 : vector<8x256xf32>
    %80 = vector.extract_strided_slice %1 {offsets = [5, 0], sizes = [1, 256], strides = [1, 1]} : vector<9x256xf32> to vector<1x256xf32>
    %81 = vector.broadcast %80 : vector<1x256xf32> to vector<8x256xf32>
    %82 = arith.mulf %81, %53 : vector<8x256xf32>
    %83 = arith.addf %79, %82 : vector<8x256xf32>
    %84 = vector.extract_strided_slice %1 {offsets = [8, 0], sizes = [1, 256], strides = [1, 1]} : vector<9x256xf32> to vector<1x256xf32>
    %85 = vector.broadcast %84 : vector<1x256xf32> to vector<8x256xf32>
    %86 = arith.mulf %85, %54 : vector<8x256xf32>
    %87 = arith.addf %83, %86 : vector<8x256xf32>
    %88 = vector.extract_strided_slice %51 {offsets = [0, 0], sizes = [8, 256], strides = [1, 1]} : vector<16x256xf32> to vector<8x256xf32>
    %89 = vector.extract_strided_slice %51 {offsets = [8, 0], sizes = [8, 256], strides = [1, 1]} : vector<16x256xf32> to vector<8x256xf32>
    %cst_17 = arith.constant 1.67653251 : f32
    %90 = vector.broadcast %cst_17 : f32 to vector<8x256xf32>
    %91 = arith.mulf %90, %88 : vector<8x256xf32>
    %cst_18 = arith.constant 0.000000e+00 : f32
    %92 = vector.broadcast %cst_18 : f32 to vector<8x256xf32>
    %93 = arith.subf %92, %88 : vector<8x256xf32>
    %94 = math.exp %93 : vector<8x256xf32>
    %cst_19 = arith.constant 1.000000e+00 : f32
    %95 = vector.broadcast %cst_19 : f32 to vector<8x256xf32>
    %96 = arith.addf %95, %94 : vector<8x256xf32>
    %97 = tpu.reciprocal %96 {approx = true} : vector<8x256xf32> -> vector<8x256xf32>
    %98 = arith.mulf %91, %97 : vector<8x256xf32>
    %cst_20 = arith.constant 1.67653251 : f32
    %99 = vector.broadcast %cst_20 : f32 to vector<8x256xf32>
    %100 = arith.mulf %99, %89 : vector<8x256xf32>
    %cst_21 = arith.constant 0.000000e+00 : f32
    %101 = vector.broadcast %cst_21 : f32 to vector<8x256xf32>
    %102 = arith.subf %101, %89 : vector<8x256xf32>
    %103 = math.exp %102 : vector<8x256xf32>
    %cst_22 = arith.constant 1.000000e+00 : f32
    %104 = vector.broadcast %cst_22 : f32 to vector<8x256xf32>
    %105 = arith.addf %104, %103 : vector<8x256xf32>
    %106 = tpu.reciprocal %105 {approx = true} : vector<8x256xf32> -> vector<8x256xf32>
    %107 = arith.mulf %100, %106 : vector<8x256xf32>
    %c0_23 = arith.constant 0 : index
    %c0_24 = arith.constant 0 : index
    %108 = vector.load %arg6[%c0_23, %c0_24] : memref<32x256xf32, #tpu.memory_space<vmem>>, vector<8x256xf32>
    tpu.vector_store %arg6[%c0_23, %c0_24], %98 {strides = array<i32>} : memref<32x256xf32, #tpu.memory_space<vmem>>, vector<8x256xf32>,
    %109 = arith.mulf %107, %65 : vector<8x256xf32>
    %c8_25 = arith.constant 8 : index
    %c0_26 = arith.constant 0 : index
    %110 = vector.load %arg6[%c8_25, %c0_26] : memref<32x256xf32, #tpu.memory_space<vmem>>, vector<8x256xf32>
    tpu.vector_store %arg6[%c8_25, %c0_26], %109 {strides = array<i32>} : memref<32x256xf32, #tpu.memory_space<vmem>>, vector<8x256xf32>,
    %111 = arith.mulf %107, %76 : vector<8x256xf32>
    %c16_27 = arith.constant 16 : index
    %c0_28 = arith.constant 0 : index
    %112 = vector.load %arg6[%c16_27, %c0_28] : memref<32x256xf32, #tpu.memory_space<vmem>>, vector<8x256xf32>
    tpu.vector_store %arg6[%c16_27, %c0_28], %111 {strides = array<i32>} : memref<32x256xf32, #tpu.memory_space<vmem>>, vector<8x256xf32>,
    %113 = arith.mulf %107, %87 : vector<8x256xf32>
    %c24_29 = arith.constant 24 : index
    %c0_30 = arith.constant 0 : index
    %114 = vector.load %arg6[%c24_29, %c0_30] : memref<32x256xf32, #tpu.memory_space<vmem>>, vector<8x256xf32>
    tpu.vector_store %arg6[%c24_29, %c0_30], %113 {strides = array<i32>} : memref<32x256xf32, #tpu.memory_space<vmem>>, vector<8x256xf32>,
    return
  }
  func.func @transform_0(%arg0: i32) -> (i32, i32) {
    %c0_i32 = arith.constant 0 : i32
    %c0_i32_0 = arith.constant 0 : i32
    return %arg0, %c0_i32 : i32, i32
  }
  func.func @transform_1(%arg0: i32) -> (i32, i32) {
    %c0_i32 = arith.constant 0 : i32
    %c0_i32_0 = arith.constant 0 : i32
    return %c0_i32, %arg0 : i32, i32
  }
  func.func @transform_2(%arg0: i32) -> (i32, i32) {
    %c0_i32 = arith.constant 0 : i32
    %c0_i32_0 = arith.constant 0 : i32
    %c0_i32_1 = arith.constant 0 : i32
    return %c0_i32, %c0_i32_0 : i32, i32
  }
  func.func @transform_3(%arg0: i32) -> (i32, i32) {
    %c0_i32 = arith.constant 0 : i32
    %c0_i32_0 = arith.constant 0 : i32
    %c0_i32_1 = arith.constant 0 : i32
    return %c0_i32, %c0_i32_0 : i32, i32
  }
  func.func @transform_4(%arg0: i32) -> (i32, i32) {
    %c0_i32 = arith.constant 0 : i32
    %c0_i32_0 = arith.constant 0 : i32
    %c0_i32_1 = arith.constant 0 : i32
    return %c0_i32, %c0_i32_0 : i32, i32
  }
  func.func @transform_5(%arg0: i32) -> (i32, i32) {
    %c0_i32 = arith.constant 0 : i32
    %c0_i32_0 = arith.constant 0 : i32
    return %c0_i32, %arg0 : i32, i32
  }
}

</mosaic_0001>

<bundles_post_ra>
// kernel: custom-call
= control target key start
LH: loop header
LB: loop body
LE: loop exit
PB: predicated region body
PF: predicated region fallthrough
CT: control target
= control target key end

     0   :  { %s6_s0 = inlined_call_operand.hbm [shape: f32[32,1000], index: 0, kind: output, shape index: {}]  }

// kernel: o3_on_o2_tp_swish_gate_forward.1
= control target key start
LH: loop header
LB: loop body
LE: loop exit
PB: predicated region body
PF: predicated region fallthrough
CT: control target
= control target key end

     0   :  { %s1194_s18 = smov 0   ;;  %s1196_s19 = smov 0   ;;  %s1507_s0 = inlined_call_operand.vmem [shape: f32[1024,32], index: 0, kind: input, shape index: {}]   ;;  %s1508_s1 = inlined_call_operand.vmem [shape: f32[9,1024], index: 1, kind: input, shape index: {}]   ;;  %s1509_s2 = inlined_call_operand.vmem [shape: f32[32,32], index: 2, kind: input, shape index: {}]   ;;  %s1510_s3 = inlined_call_operand.vmem [shape: f32[40,32], index: 3, kind: input, shape index: {}]   ;;  %s1511_s4 = inlined_call_operand.vmem [shape: f32[16,1], index: 4, kind: input, shape index: {}]   ;;  %s1512_s5 = inlined_call_operand.vmem [shape: f32[32,1024], index: 5, kind: output, shape index: {}]  }
   0x1   :  { %s1198_s20 = smov 0  }
   0x2 LB: > { %s1210_s21 = sadd.s32 4294967295, %s1160_s20   ;;  %s1213_s22 = sadd.s32 1, %s1160_s20   ;;  %s1160_s20 = sphi %s1198_s20, %s1518_s20   ;;  %s1156_s19 = sphi %s1196_s19, %s1517_s19   ;;  %s1152_s18 = sphi %s1194_s18, %s1516_s18  }
   0x3   : > { %s45_s23 = ssub.s32 %s1160_s20, %s1213_s22  ;;  %s48_s24 = sadd.s32 1, %s1156_s19 }
   0x4   : > { %p46_p0 = scmp.eq.s32.totalorder %s45_s23, 0  ;;  %p55_p1 = scmp.ne.s32.totalorder %s1156_s19, %s1152_s18 }
   0x5   : > { %p56_p2 = scmp.eq.s32.totalorder %s1160_s20, 0  ;;  %p148_p3 = scmp.eq.s32.totalorder %s1210_s21, 3 }
   0x6   : > { %s1223_s25 = scalar_select %p46_p0, %s1156_s19, %s48_s24  }
   0x7   : > { %p57_p4 = por %p56_p2, %p55_p1  ;;  %p1225_p5 = por %p148_p3, %p55_p1 }
   0x8   : > { %p940_p6 = scmp.ge.s32.totalorder %s1160_s20, 4 }
   0xa   : > { %179 = sbr.rel (%p940_p6) target bundleno = 24 (0x18), region = 28 }
  0x11   : > { %191 = sbr.rel (!%p57_p4) target bundleno = 24 (0x18), region = 36  ;;  %s193_s27 = sand.u32 (%p57_p4), 1, %s1156_s19  }
  0x12   : > { %s997_s28 = sshll.u32 (%p57_p4), %s1160_s20, 4  ;;  %s941_s29 = sshll.u32 (%p57_p4), %s193_s27, 5 }
  0x13   : > { %s198_s7 = scalar_lea.vmem (%p57_p4), %s1508_s1, %s997_s28  ;;  %s195_s8 = scalar_lea.vmem (%p57_p4), [#allocation3], %s941_s29 }
  0x14   : > { %v211_v0 = vld [vmem:[%s198_s7] sm:$0xff] (%p57_p4)  ;;  %v213_v1 = vld [vmem:[%s198_s7 + $0x8] sm:$0xff] (%p57_p4) }
  0x15   : > { %v215_v2 = vld [vmem:[%s198_s7 + $0x40] sm:$0xff] (%p57_p4)  ;;  %212 = vst [vmem:[%s195_s8] sm:$0xff] (%p57_p4), %v211_v0  ;;  %214 = vst [vmem:[%s195_s8 + $0x8] sm:$0xff] (%p57_p4), %v213_v1  ;;  %v217_v3 = vld [vmem:[%s198_s7 + $0x48] sm:$0xff] (%p57_p4) }
  0x16   : > { %216 = vst [vmem:[%s195_s8 + $0x10] sm:$0xff] (%p57_p4), %v215_v2  ;;  %218 = vst [vmem:[%s195_s8 + $0x18] sm:$0xff] (%p57_p4), %v217_v3 }
  0x18 PF: > { %p944_p7 = scmp.ge.s32.totalorder %s1160_s20, 1  ;;  %p223_p8 = scmp.lt.s32.totalorder %s1160_s20, 5 }
  0x1a   : > { %p224_p9 = pnand %p944_p7, %p223_p8 }
  0x1b   : > { %s947_s9 = sshll.u32 (!%p224_p9), %s1210_s21, 5  ;;  %vm309_vm0 = vcmask (!%p224_p9), 261120   ;;  %v1241_v4 = vld [vmem:[%s1509_s2] sm:$0xff] (!%p224_p9)  ;;  %v306_v54 = vld [vmem:[%s1509_s2 + $0x8] sm:$0xff] (!%p224_p9)  ;;  %v307_v55 = vld [vmem:[%s1509_s2 + $0x10] sm:$0xff] (!%p224_p9)  ;;  %v1162_v57 = vmov (!%p224_p9), 0.0   ;;  %v509_v61 = vlaneseq (!%p224_p9) }
  0x1c   : > { %227 = sbr.rel (%p224_p9) target bundleno = 605 (0x25d), region = 59  ;;  %p262_p10 = scmp.lt.s32.totalorder (!%p224_p9), %s947_s9, 127  ;;  %1031 = vmatprep.mubr.msk.f32.mxu0 (!%p224_p9), %vm309_vm0, %v1241_v4  ;;  %vm1252_vm1 = vmpackc.low (!%p224_p9), %vm309_vm0, %vm309_vm0  ;;  %v308_v56 = vld [vmem:[%s1509_s2 + $0x18] sm:$0xff] (!%p224_p9)  ;;  %709 = vmatprep.mubr.f32.mxu1 (!%p224_p9), %v1162_v57  ;;  %v741_v58 = vld [vmem:[%s1511_s4 + $0x8] sm:$0xff] (!%p224_p9)  ;;  %v1163_v59 = vmov (!%p224_p9), 0  }
  0x1d   : > { %1121 = vset.pattern.permute.xlu0 (!%p224_p9), %v1163_v59  ;;  %v740_v60 = vld [vmem:[%s1511_s4] sm:$0xff] (!%p224_p9)  ;;  %s230_s7 = sand.u32 (!%p224_p9), 1, %s1152_s18   ;;  %v510_v62 = vshrl.u32 (!%p224_p9), %v509_v61, 7 }
  0x1e   : > { %749 = vperm.xlu0 (!%p224_p9), %1121, %v741_v58   ;;  %s945_s8 = sshll.u32 (!%p224_p9), %s230_s7, 5  ;;  %s946_s24 = sshll.u32 (!%p224_p9), %s230_s7, 6 }
  0x1f   : > { %v511_v0 = vsub.s32 (!%p224_p9), 0, %v510_v62  ;;  %v547_v1 = vsub.s32 (!%p224_p9), 3, %v510_v62  ;;  %v583_v2 = vsub.s32 (!%p224_p9), 6, %v510_v62  ;;  %s1471_s27 = scalar_lea.vmem (!%p224_p9), [#allocation4], %s946_s24 }
  0x22   : > { %744 = vperm.xlu0 (!%p224_p9), %1121, %v740_v60  }
  0x23   : > { %s1520_s9 = smov (!%p262_p10, %s947_s9), 127  ;;  %s998_s18 = sshll.u32 (%p1225_p5), %s1210_s21, 4 }
  0x24   : > { %s948_s12 = sshll.u32 %s1520_s9, 3  ;;  %s1351_s9 = scalar_lea.vmem [#allocation3], %s945_s8 }
  0x25   : > { %s1248_s15 = scalar_lea.vmem %s1507_s0, %s948_s12  ;;  %v302_v5 = vld [vmem:[%s1351_s9 + $0x8] sm:$0xff]  ;;  %s837_s30 = scalar_lea.vmem (%p1225_p5), %s1512_s5, %s998_s18 }
  0x26   : > { %v285_v6 = vld [vmem:[%s1248_s15 + $0x80] sm:$0xff]  ;;  %v286_v7 = vld [vmem:[%s1248_s15 + $0x88] sm:$0xff]  ;;  %v287_v11 = vld [vmem:[%s1248_s15 + $0x90] sm:$0xff] }
  0x27   : > { %v269_v8 = vld [vmem:[%s1248_s15] sm:$0xff]  ;;  %v1039_v9 = vpack.c.bf16 %v286_v7, %v285_v6  ;;  %v270_v10 = vld [vmem:[%s1248_s15 + $0x8] sm:$0xff]  ;;  %v288_v12 = vld [vmem:[%s1248_s15 + $0x98] sm:$0xff]  ;;  %v521_v6 = vsub.s32 1, %v510_v62  ;;  %v557_v7 = vsub.s32 4, %v510_v62 }
  0x28   : > { %v1042_v13 = vpack.c.bf16 %v270_v10, %v269_v8  ;;  %v1045_v14 = vpack.c.bf16 %v288_v12, %v287_v11  ;;  %v271_v15 = vld [vmem:[%s1248_s15 + $0x10] sm:$0xff]  ;;  %v272_v16 = vld [vmem:[%s1248_s15 + $0x18] sm:$0xff]  ;;  %v289_v17 = vld [vmem:[%s1248_s15 + $0xa0] sm:$0xff]  ;;  %v593_v8 = vsub.s32 7, %v510_v62  ;;  %v569_v10 = vsub.s32 5, %v510_v62 }
  0x29   : > { %1041 = vmatprep.subr.msk.bf16.mxu0 %vm1252_vm1, %v1039_v9  ;;  %v290_v18 = vld [vmem:[%s1248_s15 + $0xa8] sm:$0xff]  ;;  %v1048_v19 = vpack.c.bf16 %v272_v16, %v271_v15  ;;  %v273_v21 = vld [vmem:[%s1248_s15 + $0x20] sm:$0xff]  ;;  %v291_v23 = vld [vmem:[%s1248_s15 + $0xb0] sm:$0xff]  ;;  %v533_v9 = vsub.s32 2, %v510_v62  ;;  %v1361_v15 = vrot.slane %v302_v5, %v511_v0 }
  0x2a   : > { %1044 = vmatpush3.bf16.xpose.msk.msra.mxu0 %vm1252_vm1, %v1042_v13  ;;  %v1051_v20 = vpack.c.bf16 %v290_v18, %v289_v17  ;;  %v274_v22 = vld [vmem:[%s1248_s15 + $0x28] sm:$0xff]  ;;  %v292_v24 = vld [vmem:[%s1248_s15 + $0xb8] sm:$0xff]  ;;  %v275_v27 = vld [vmem:[%s1248_s15 + $0x30] sm:$0xff]  ;;  %v1363_v17 = vrot.slane %v302_v5, %v547_v1 }
  0x2b   : > { %1047 = vmatprep.subr.msk.bf16.mxu0 %vm1252_vm1, %v1045_v14  ;;  %v1054_v25 = vpack.c.bf16 %v274_v22, %v273_v21  ;;  %v1057_v26 = vpack.c.bf16 %v292_v24, %v291_v23  ;;  %v276_v28 = vld [vmem:[%s1248_s15 + $0x38] sm:$0xff]  ;;  %v293_v29 = vld [vmem:[%s1248_s15 + $0xc0] sm:$0xff]  ;;  %v294_v30 = vld [vmem:[%s1248_s15 + $0xc8] sm:$0xff]  ;;  %v1371_v21 = vrot.slane %v302_v5, %v583_v2  ;;  %v1373_v22 = vrot.slane %v302_v5, %v521_v6 }
  0x2c   : > { %v1060_v31 = vpack.c.bf16 %v276_v28, %v275_v27  ;;  %v1063_v32 = vpack.c.bf16 %v294_v30, %v293_v29  ;;  %v277_v33 = vld [vmem:[%s1248_s15 + $0x40] sm:$0xff]  ;;  %v278_v34 = vld [vmem:[%s1248_s15 + $0x48] sm:$0xff]  ;;  %v295_v35 = vld [vmem:[%s1248_s15 + $0xd0] sm:$0xff]  ;;  %v1375_v23 = vrot.slane %v302_v5, %v557_v7  ;;  %v1377_v24 = vrot.slane %v302_v5, %v593_v8 }
  0x2d   : > { %v296_v36 = vld [vmem:[%s1248_s15 + $0xd8] sm:$0xff]  ;;  %v1066_v37 = vpack.c.bf16 %v278_v34, %v277_v33  ;;  %v279_v39 = vld [vmem:[%s1248_s15 + $0x50] sm:$0xff]  ;;  %v297_v41 = vld [vmem:[%s1248_s15 + $0xe0] sm:$0xff]  ;;  %v1383_v27 = vrot.slane %v302_v5, %v533_v9  ;;  %v1385_v28 = vrot.slane %v302_v5, %v569_v10 }
  0x2e   : > { %v1069_v38 = vpack.c.bf16 %v296_v36, %v295_v35  ;;  %v280_v40 = vld [vmem:[%s1248_s15 + $0x58] sm:$0xff]  ;;  %v298_v42 = vld [vmem:[%s1248_s15 + $0xe8] sm:$0xff]  ;;  %v281_v45 = vld [vmem:[%s1248_s15 + $0x60] sm:$0xff] }
  0x2f   : > { %v1072_v43 = vpack.c.bf16 %v280_v40, %v279_v39  ;;  %v1075_v44 = vpack.c.bf16 %v298_v42, %v297_v41  ;;  %v282_v46 = vld [vmem:[%s1248_s15 + $0x68] sm:$0xff]  ;;  %v299_v47 = vld [vmem:[%s1248_s15 + $0xf0] sm:$0xff]  ;;  %v300_v48 = vld [vmem:[%s1248_s15 + $0xf8] sm:$0xff] }
  0x30   : > { %v1078_v49 = vpack.c.bf16 %v282_v46, %v281_v45  ;;  %v1081_v50 = vpack.c.bf16 %v300_v48, %v299_v47  ;;  %v283_v51 = vld [vmem:[%s1248_s15 + $0x70] sm:$0xff]  ;;  %v284_v52 = vld [vmem:[%s1248_s15 + $0x78] sm:$0xff] }
  0x31   : > { %v1084_v53 = vpack.c.bf16 %v284_v52, %v283_v51  ;;  %v1403_v46 = vld [vmem:[%s1351_s9 + $0x18] ss:$0 sm:$0xff] }
  0x32   : > { %1050 = vmatpush3.bf16.xpose.msk.msra.mxu0 %vm1252_vm1, %v1048_v19 }
  0x33   : > { %1053 = vmatprep.subr.msk.bf16.mxu0 %vm1252_vm1, %v1051_v20 }
  0x3a   : > { %1056 = vmatpush3.bf16.xpose.msk.msra.mxu0 %vm1252_vm1, %v1054_v25 }
  0x3b   : > { %1059 = vmatprep.subr.msk.bf16.mxu0 %vm1252_vm1, %v1057_v26 }
  0x42   : > { %1062 = vmatpush3.bf16.xpose.msk.msra.mxu0 %vm1252_vm1, %v1060_v31 }
  0x43   : > { %1065 = vmatprep.subr.msk.bf16.mxu0 %vm1252_vm1, %v1063_v32 }
  0x4a   : > { %1068 = vmatpush3.bf16.xpose.msk.msra.mxu0 %vm1252_vm1, %v1066_v37 }
  0x4b   : > { %1071 = vmatprep.subr.msk.bf16.mxu0 %vm1252_vm1, %v1069_v38 }
  0x52   : > { %1074 = vmatpush3.bf16.xpose.msk.msra.mxu0 %vm1252_vm1, %v1072_v43  ;;  %v1400_v43 = vld [vmem:[%s1351_s9 + $0x10] ss:$0 sm:$0xff] }
  0x53   : > { %1077 = vmatprep.subr.msk.bf16.mxu0 %vm1252_vm1, %v1075_v44 }
  0x5a   : > { %1080 = vmatpush3.bf16.xpose.msk.msra.mxu0 %vm1252_vm1, %v1078_v49 }
  0x5b   : > { %1083 = vmatprep.subr.msk.bf16.mxu0 %vm1252_vm1, %v1081_v50 }
  0x62   : > { %1086 = vmatpush3.bf16.xpose.msk.msra.mxu0 %vm1252_vm1, %v1084_v53 }
  0x69   : > { %1032 = vmatmul.mubr.msk.f32.vlgmr.msra.gmra.mrb[0].mxu0 %vm309_vm0, %v1241_v4  ;;  %v301_v4 = vld [vmem:[%s1351_s9] sm:$0xff] }
  0x6a   : > { %1033 = vmatprep.mubr.msk.f32.mxu0 %vm309_vm0, %v306_v54  ;;  %v1355_v12 = vrot.slane %v301_v4, %v511_v0  ;;  %v1357_v13 = vrot.slane %v301_v4, %v547_v1  ;;  %v1359_v14 = vrot.slane %v301_v4, %v583_v2  ;;  %v1365_v18 = vrot.slane %v301_v4, %v521_v6 }
  0x6b   : > { %v1367_v19 = vrot.slane %v301_v4, %v557_v7  ;;  %v1369_v20 = vrot.slane %v301_v4, %v593_v8  ;;  %v1379_v25 = vrot.slane %v301_v4, %v533_v9  ;;  %v1381_v26 = vrot.slane %v301_v4, %v569_v10  ;;  %v617_v8 = vld [vmem:[%s1510_s3] sm:$0xff]  ;;  %v620_v9 = vld [vmem:[%s1510_s3 + $0x18] sm:$0xff] }
  0x6c   : > { %v621_v10 = vld [vmem:[%s1510_s3 + $0x20] sm:$0xff] }
  0x6d   : > { %1034 = vmatmul.mubr.msk.f32.gmra.mrb[2].mxu0 %vm309_vm0, %v306_v54 }
  0x6e   : > { %1035 = vmatprep.mubr.msk.f32.mxu0 %vm309_vm0, %v307_v55 }
  0x71   : > { %1036 = vmatmul.mubr.msk.f32.gmra.mrb[4].mxu0 %vm309_vm0, %v307_v55 }
  0x72   : > { %1037 = vmatprep.mubr.msk.f32.mxu0 %vm309_vm0, %v308_v56 }
  0x75   : > { %1038 = vmatmul.mubr.msk.f32.gmra.mrb[6].mxu0 %vm309_vm0, %v308_v56 }
 0x13c   : > { %v1347_v63 = vpop.f32.mrb[0].mxu0 }
 0x13d   : > { %v1349_v3 = vpop.f32.mrb[1].mxu0 }
 0x140   : > { %v490_v11 = vpop.f32.mrb[2].mxu0 }
 0x141   : > { %v492_v16 = vpop.f32.mrb[3].mxu0  ;;  %v517_v29 = vmul.f32 %v1355_v12, %v490_v11  ;;  %v553_v30 = vmul.f32 %v1357_v13, %v490_v11  ;;  %v589_v31 = vmul.f32 %v1359_v14, %v490_v11  ;;  %v750_v11 = vpop.permute.xlu0 %749 }
 0x142   : > { %v518_v32 = vmul.f32 %v1361_v15, %v492_v16  ;;  %v554_v34 = vmul.f32 %v1363_v17, %v492_v16  ;;  %v590_v39 = vmul.f32 %v1371_v21, %v492_v16 }
 0x144   : > { %v496_v33 = vpop.f32.mrb[4].mxu0 }
 0x145   : > { %v527_v35 = vmul.f32 %v1365_v18, %v496_v33  ;;  %v563_v36 = vmul.f32 %v1367_v19, %v496_v33  ;;  %v599_v37 = vmul.f32 %v1369_v20, %v496_v33  ;;  %v498_v38 = vpop.f32.mrb[5].mxu0  ;;  %v745_v16 = vpop.permute.xlu0 %744 }
 0x146   : > { %v528_v40 = vmul.f32 %v1373_v22, %v498_v38  ;;  %v564_v41 = vmul.f32 %v1375_v23, %v498_v38  ;;  %v600_v42 = vmul.f32 %v1377_v24, %v498_v38 }
 0x147   : > { %v565_v44 = vadd.f32 %v563_v36, %v553_v30  ;;  %v601_v45 = vadd.f32 %v599_v37, %v589_v31  ;;  %v529_v47 = vadd.f32 %v527_v35, %v517_v29 }
 0x148   : > { %v566_v48 = vadd.f32 %v564_v41, %v554_v34  ;;  %v602_v49 = vadd.f32 %v600_v42, %v590_v39  ;;  %v502_v50 = vpop.f32.mrb[6].mxu0  ;;  %v530_v51 = vadd.f32 %v528_v40, %v518_v32 }
 0x149   : > { %v539_v52 = vmul.f32 %v1379_v25, %v502_v50  ;;  %v575_v53 = vmul.f32 %v1381_v26, %v502_v50  ;;  %v611_v54 = vmul.f32 %v1400_v43, %v502_v50  ;;  %v504_v55 = vpop.f32.mrb[7].mxu0 }
 0x14a   : > { %v540_v56 = vmul.f32 %v1383_v27, %v504_v55  ;;  %v576_v58 = vmul.f32 %v1385_v28, %v504_v55  ;;  %v612_v59 = vmul.f32 %v1403_v46, %v504_v55 }
 0x14b   : > { %v577_v60 = vadd.f32 %v575_v53, %v565_v44  ;;  %v613_v61 = vadd.f32 %v611_v54, %v601_v45  ;;  %v541_v62 = vadd.f32 %v539_v52, %v529_v47 }
 0x14c   : > { %v578_v0 = vadd.f32 %v576_v58, %v566_v48  ;;  %v614_v1 = vadd.f32 %v612_v59, %v602_v49  ;;  %v542_v2 = vadd.f32 %v540_v56, %v530_v51 }
 0x14d   : > { %v1089_v4 = vpack.c.bf16 %v541_v62, %v1347_v63  ;;  %v1093_v5 = vpack.c.bf16 %v613_v61, %v577_v60  ;;  %v618_v63 = vld [vmem:[%s1510_s3 + $0x8] sm:$0xff] }
 0x14e   : > { %v1087_v6 = vpack.c.bf16 %v542_v2, %v1349_v3  ;;  %v1091_v7 = vpack.c.bf16 %v614_v1, %v578_v0  ;;  %v619_v3 = vld [vmem:[%s1510_s3 + $0x10] sm:$0xff] }
 0x150   : > { %1088 = vmatprep.subr.bf16.mxu1 %v1087_v6 }
 0x151   : > { %1090 = vmatpush1.bf16.msra.mxu1 %v1089_v4 }
 0x152   : > { %1092 = vmatprep.subr.bf16.mxu1 %v1091_v7 }
 0x155   : > { %1094 = vmatpush1.bf16.msra.mxu1 %v1093_v5 }
 0x158   : > { %987 = vmatmul.mubr.msk.f32.vlgmr.msra.gmra.mrb[0].mxu1 %vm309_vm0, %v617_v8 }
 0x159   : > { %715 = vmatprep.mubr.f32.mxu1 %v1162_v57 }
 0x15c   : > { %988 = vmatmul.mubr.msk.f32.gmra.mrb[2].mxu1 %vm309_vm0, %v618_v63 }
 0x15d   : > { %721 = vmatprep.mubr.f32.mxu1 %v1162_v57 }
 0x160   : > { %989 = vmatmul.mubr.msk.f32.gmra.mrb[4].mxu1 %vm309_vm0, %v619_v3 }
 0x161   : > { %727 = vmatprep.mubr.f32.mxu1 %v1162_v57 }
 0x164   : > { %990 = vmatmul.mubr.msk.f32.gmra.mrb[6].mxu1 %vm309_vm0, %v620_v9 }
 0x165   : > { %733 = vmatprep.mubr.f32.mxu1 %v1162_v57 }
 0x168   : > { %991 = vmatmul.mubr.msk.f32.gmra.mrb[8].mxu1 %vm309_vm0, %v621_v10 }
 0x22b   : > { %v711_v29 = vpop.f32.mrb[0].mxu1 }
 0x22c   : > { %v1437_v30 = vadd.f32 %v745_v16, %v711_v29  ;;  %v713_v31 = vpop.f32.mrb[1].mxu1 }
 0x22d   : > { %v1439_v32 = vadd.f32 %v745_v16, %v713_v31 }
 0x22e   : > { %v788_v33 = vsub.f32 0.0, %v1437_v30 }
 0x22f   : > { %v789_v34 = vsub.f32 0.0, %v1439_v32  ;;  %v717_v35 = vpop.f32.mrb[2].mxu1 }
 0x230   : > { %v790_v57 = vmul.f32 1.442695, %v788_v33  ;;  %v1443_v36 = vadd.f32 %v750_v11, %v717_v35  ;;  %v719_v37 = vpop.f32.mrb[3].mxu1 }
 0x231   : > { %v792_v38 = vmul.f32 1.442695, %v789_v34  ;;  %v1445_v39 = vadd.f32 %v750_v11, %v719_v37 }
 0x232   : > { %1122 = vpow2.f32 %v790_v57  ;;  %v802_v40 = vsub.f32 0.0, %v1443_v36  ;;  %v800_v33 = vmul.f32 1.6765325, %v1443_v36 }
 0x233   : > { %1124 = vpow2.f32 %v792_v38  ;;  %v803_v41 = vsub.f32 0.0, %v1445_v39  ;;  %v723_v42 = vpop.f32.mrb[4].mxu1 }
 0x234   : > { %v804_v44 = vmul.f32 1.442695, %v802_v40  ;;  %v725_v45 = vpop.f32.mrb[5].mxu1  ;;  %v756_v48 = vmul.f32 %v723_v42, %v1355_v12  ;;  %v766_v49 = vmul.f32 %v723_v42, %v1365_v18  ;;  %v776_v50 = vmul.f32 %v723_v42, %v1379_v25 }
 0x235   : > { %v806_v47 = vmul.f32 1.442695, %v803_v41  ;;  %v757_v51 = vmul.f32 %v725_v45, %v1361_v15  ;;  %v767_v52 = vmul.f32 %v725_v45, %v1373_v22  ;;  %v777_v53 = vmul.f32 %v725_v45, %v1383_v27 }
 0x236   : > { %1126 = vpow2.f32 %v804_v44 }
 0x237   : > { %1128 = vpow2.f32 %v806_v47  ;;  %v729_v54 = vpop.f32.mrb[6].mxu1 }
 0x238   : > { %v758_v55 = vmul.f32 %v729_v54, %v1357_v13  ;;  %v768_v56 = vmul.f32 %v729_v54, %v1367_v19  ;;  %v778_v58 = vmul.f32 %v729_v54, %v1381_v26  ;;  %v731_v59 = vpop.f32.mrb[7].mxu1 }
 0x239   : > { %v759_v12 = vmul.f32 %v731_v59, %v1363_v17  ;;  %v769_v18 = vmul.f32 %v731_v59, %v1375_v23  ;;  %v779_v25 = vmul.f32 %v731_v59, %v1385_v28 }
 0x23a   : > { %v760_v60 = vadd.f32 %v758_v55, %v756_v48  ;;  %v770_v15 = vadd.f32 %v768_v56, %v766_v49  ;;  %v780_v61 = vadd.f32 %v778_v58, %v776_v50 }
 0x23b   : > { %v761_v22 = vadd.f32 %v759_v12, %v757_v51  ;;  %v771_v62 = vadd.f32 %v769_v18, %v767_v52  ;;  %v781_v27 = vadd.f32 %v779_v25, %v777_v53  ;;  %v735_v0 = vpop.f32.mrb[8].mxu1 }
 0x23c   : > { %v1123_v1 = vpop.eup %1122  ;;  %v762_v13 = vmul.f32 %v735_v0, %v1359_v14  ;;  %v772_v19 = vmul.f32 %v735_v0, %v1369_v20  ;;  %v782_v26 = vmul.f32 %v1400_v43, %v735_v0  ;;  %v737_v2 = vpop.f32.mrb[9].mxu1 }
 0x23d   : > { %v1125_v17 = vpop.eup %1124  ;;  %v794_v4 = vadd.f32 1.0, %v1123_v1  ;;  %v763_v23 = vmul.f32 %v737_v2, %v1371_v21  ;;  %v773_v28 = vmul.f32 %v737_v2, %v1377_v24  ;;  %v783_v5 = vmul.f32 %v1403_v46, %v737_v2 }
 0x23e   : > { %v795_v6 = vadd.f32 1.0, %v1125_v17  ;;  %v764_v7 = vadd.f32 %v762_v13, %v760_v60  ;;  %v774_v8 = vadd.f32 %v772_v19, %v770_v15  ;;  %v784_v63 = vadd.f32 %v782_v26, %v780_v61 }
 0x23f   : > { %1130 = vrcp.f32 %v794_v4  ;;  %v765_v14 = vadd.f32 %v763_v23, %v761_v22  ;;  %v775_v3 = vadd.f32 %v773_v28, %v771_v62  ;;  %v785_v20 = vadd.f32 %v783_v5, %v781_v27 }
 0x240   : > { %v1127_v9 = vpop.eup %1126  ;;  %1132 = vrcp.f32 %v795_v6  ;;  %v786_v21 = vmul.f32 1.6765325, %v1437_v30  ;;  %v787_v46 = vmul.f32 1.6765325, %v1439_v32  ;;  %v801_v30 = vmul.f32 1.6765325, %v1445_v39 }
 0x241   : > { %v1129_v43 = vpop.eup %1128  ;;  %v808_v10 = vadd.f32 1.0, %v1127_v9 }
 0x242   : > { %v809_v11 = vadd.f32 1.0, %v1129_v43 }
 0x243   : > { %1134 = vrcp.f32 %v808_v10 }
 0x244   : > { %1136 = vrcp.f32 %v809_v11 }
 0x249   : > { %v1131_v24 = vpop.eup %1130 }
 0x24a   : > { %v1133_v16 = vpop.eup %1132  ;;  %v798_v29 = vmul.f32 %v1131_v24, %v786_v21 }
 0x24b   : > { %v799_v31 = vmul.f32 %v1133_v16, %v787_v46 }
 0x24c   : > { %814 = vst [vmem:[%s1471_s27] sm:$0xff] %v798_v29 }
 0x24d   : > { %v1135_v34 = vpop.eup %1134  ;;  %815 = vst [vmem:[%s1471_s27 + $0x8] sm:$0xff] %v799_v31 }
 0x24e   : > { %v1137_v32 = vpop.eup %1136  ;;  %v812_v35 = vmul.f32 %v1135_v34, %v800_v33  ;;  %834 = sbr.rel (!%p1225_p5) target bundleno = 605 (0x25d), region = 67 }
 0x24f   : > { %v813_v57 = vmul.f32 %v1137_v32, %v801_v30 }
 0x250   : > { %v816_v37 = vmul.f32 %v812_v35, %v764_v7  ;;  %v820_v38 = vmul.f32 %v812_v35, %v774_v8  ;;  %v824_v40 = vmul.f32 %v812_v35, %v784_v63 }
 0x251   : > { %v817_v41 = vmul.f32 %v813_v57, %v765_v14  ;;  %v821_v42 = vmul.f32 %v813_v57, %v775_v3  ;;  %v825_v44 = vmul.f32 %v813_v57, %v785_v20 }
 0x252   : > { %818 = vst [vmem:[%s1471_s27 + $0x10] sm:$0xff] %v816_v37  ;;  %822 = vst [vmem:[%s1471_s27 + $0x20] sm:$0xff] %v820_v38 }
 0x253   : > { %826 = vst [vmem:[%s1471_s27 + $0x30] sm:$0xff] %v824_v40  ;;  %819 = vst [vmem:[%s1471_s27 + $0x18] sm:$0xff] %v817_v41  ;;  %v850_v36 = vld [vmem:[%s1471_s27] sm:$0xff] (%p1225_p5) }
 0x254   : > { %823 = vst [vmem:[%s1471_s27 + $0x28] sm:$0xff] %v821_v42  ;;  %827 = vst [vmem:[%s1471_s27 + $0x38] sm:$0xff] %v825_v44  ;;  %v852_v39 = vld [vmem:[%s1471_s27 + $0x8] sm:$0xff] (%p1225_p5) }
 0x255   : > { %851 = vst [vmem:[%s837_s30] sm:$0xff] %v850_v36  ;;  %853 = vst [vmem:[%s837_s30 + $0x8] sm:$0xff] %v852_v39 }
 0x259   : > { %v854_v45 = vld [vmem:[%s1471_s27 + $0x10] sm:$0xff]  ;;  %v858_v48 = vld [vmem:[%s1471_s27 + $0x20] sm:$0xff] }
 0x25a   : > { %v856_v47 = vld [vmem:[%s1471_s27 + $0x18] sm:$0xff]  ;;  %855 = vst [vmem:[%s837_s30 + $0x40] sm:$0xff] %v854_v45  ;;  %859 = vst [vmem:[%s837_s30 + $0x80] sm:$0xff] %v858_v48  ;;  %v862_v50 = vld [vmem:[%s1471_s27 + $0x30] sm:$0xff] }
 0x25b   : > { %v860_v49 = vld [vmem:[%s1471_s27 + $0x28] sm:$0xff]  ;;  %857 = vst [vmem:[%s837_s30 + $0x48] sm:$0xff] %v856_v47  ;;  %v864_v51 = vld [vmem:[%s1471_s27 + $0x38] sm:$0xff]  ;;  %863 = vst [vmem:[%s837_s30 + $0xc0] sm:$0xff] %v862_v50 }
 0x25c   : > { %861 = vst [vmem:[%s837_s30 + $0x88] sm:$0xff] %v860_v49  ;;  %865 = vst [vmem:[%s837_s30 + $0xc8] sm:$0xff] %v864_v51 }
 0x25d PF: > { %p12_p11 = scmp.ge.s32.totalorder %s1213_s22, 6   ;;  %s1516_s18 = smov %s1156_s19 }
 0x25e   : > { %s1517_s19 = smov %s1223_s25  ;;  %s1518_s20 = smov %s1213_s22 }
 0x25f   :  { %14 = sbr.rel (!%p12_p11) target bundleno = 2 (0x2), region = 124 }

</bundles_post_ra>
